<compile_context>
chip_gen: v6e
topology: v6e:2x2x1
jax: 0.10.0
libtpu: 0.0.40
codegen_flags: <defaults>
</compile_context>

<pallas_src>
import jax
import jax.numpy as jnp
from jax.experimental import pallas as pl
from jax.experimental.pallas import tpu as pltpu


def _round_up(n, m):
    return ((n + m - 1) // m) * m


def _mlp_kernel(x_ref, p1_ref, p2_ref, o_ref):
    # p1 = [w1 (In_pad, H_pad) ; b1 row ; 7 zero rows]  -> (In_pad + 8, H_pad)
    # p2 = [w2 (H_pad, Out_pad); b2 row ; 7 zero rows]  -> (H_pad + 8, Out_pad)
    in_pad = x_ref.shape[1]
    h_pad = p2_ref.shape[0] - 8

    w1 = p1_ref[:in_pad, :]             # (In_pad, H_pad)  - static, 8-aligned slice
    b1 = p1_ref[in_pad:in_pad + 1, :]   # (1, H_pad)
    w2 = p2_ref[:h_pad, :]              # (H_pad, Out_pad)
    b2 = p2_ref[h_pad:h_pad + 1, :]     # (1, Out_pad)

    # First linear: MXU matmul with f32 accumulation, bias add in f32.
    h = jnp.dot(x_ref[...], w1, preferred_element_type=jnp.float32) + b1
    # leaky_relu, PyTorch default negative_slope = 0.01 (kept in f32: v5e has
    # no bf16 VPU path, and f32 activation math costs nothing extra here).
    h = jnp.where(h > 0, h, 0.01 * h)
    # Second linear: cast back to the weight dtype for the MXU, accumulate f32.
    out = jnp.dot(h.astype(w2.dtype), w2, preferred_element_type=jnp.float32) + b2
    o_ref[...] = out.astype(o_ref.dtype)


def nn_forward(x, w1, b1, w2, b2, *, compute_dtype=None, block_b=512):
    """Forward pass of NN(inSize, outSize, layers=[hidden]).

    x: (B, In); w1: (In, H); b1: (H,); w2: (H, Out); b2: (Out,).
    compute_dtype: optionally cast matmul operands (e.g. jnp.bfloat16 on
        v6e/v7x); accumulation and activation math stay f32.
    block_b: batch tile size (rounded usage: multiple of 8, capped by B).
    """
    out_dtype = x.dtype
    B, In = x.shape
    H = w1.shape[1]
    Out = w2.shape[1]

    # Lane-dense / (8,128)-aligned padded dims.
    in_pad = _round_up(In, 128)
    h_pad = _round_up(H, 128)
    out_pad = _round_up(Out, 128)

    # Batch tile: multiple of 8, no bigger than needed.
    tb = min(block_b, _round_up(B, 8))
    tb = _round_up(tb, 8)
    b_pad = _round_up(B, tb)
    grid = (b_pad // tb,)

    # Zero-pad the activation and pack (weight | bias-row | zero rows) so the
    # kernel sees 3 operands instead of 5 (fewer DMA descriptors per call).
    x_p = jnp.pad(x, ((0, b_pad - B), (0, in_pad - In)))
    w1_p = jnp.pad(w1, ((0, in_pad - In), (0, h_pad - H)))
    b1_p = jnp.pad(b1.reshape(1, H), ((0, 7), (0, h_pad - H)))
    p1 = jnp.concatenate([w1_p, b1_p], axis=0)          # (In_pad + 8, H_pad)
    w2_p = jnp.pad(w2, ((0, h_pad - H), (0, out_pad - Out)))
    b2_p = jnp.pad(b2.reshape(1, Out), ((0, 7), (0, out_pad - Out)))
    p2 = jnp.concatenate([w2_p, b2_p], axis=0)          # (H_pad + 8, Out_pad)

    if compute_dtype is not None:
        x_p = x_p.astype(compute_dtype)
        p1 = p1.astype(compute_dtype)
        p2 = p2.astype(compute_dtype)

    # VMEM budget (per tile, f32 worst case):
    #   2*(tb*in_pad + tb*out_pad)*4B double-buffered x/out + tb*h_pad*4B live h
    #   + resident packed weights.  With tb<=512 and 128-wide features this is
    #   well under 2 MiB -> comfortably inside the scoped limit on all of
    #   v5e / v6e / v7x, so no vmem_limit_bytes override is needed.
    out_padded = pl.pallas_call(
        _mlp_kernel,
        out_shape=jax.ShapeDtypeStruct((b_pad, out_pad), out_dtype),
        grid=grid,
        in_specs=[
            pl.BlockSpec((tb, in_pad), lambda i: (i, 0)),      # streams with grid
            pl.BlockSpec(p1.shape, lambda i: (0, 0)),          # VMEM-resident
            pl.BlockSpec(p2.shape, lambda i: (0, 0)),          # VMEM-resident
        ],
        out_specs=pl.BlockSpec((tb, out_pad), lambda i: (i, 0)),
        compiler_params=pltpu.CompilerParams(
            dimension_semantics=("parallel",)),                # v7x: 2 TCs
    )(x_p, p1, p2)

    return out_padded[:B, :Out]


def init_params(key, in_size, hidden, out_size, dtype=jnp.float32):
    """Deterministic init mimicking nn.Linear's U(-1/sqrt(fan_in), 1/sqrt(fan_in))."""
    k1, k2, k3, k4 = jax.random.split(key, 4)
    bound1 = 1.0 / jnp.sqrt(in_size)
    bound2 = 1.0 / jnp.sqrt(hidden)
    # Stored directly in (in, out) layout (i.e. PyTorch weight transposed).
    w1 = jax.random.uniform(k1, (in_size, hidden), dtype, -bound1, bound1)
    b1 = jax.random.uniform(k2, (hidden,), dtype, -bound1, bound1)
    w2 = jax.random.uniform(k3, (hidden, out_size), dtype, -bound2, bound2)
    b2 = jax.random.uniform(k4, (out_size,), dtype, -bound2, bound2)
    return w1, b1, w2, b2


def nn_reference(x, w1, b1, w2, b2):
    h = x @ w1 + b1
    h = jnp.where(h > 0, h, 0.01 * h)
    return h @ w2 + b2


if __name__ == "__main__":
    # NN(inSize=32, outSize=8, layers=[32])
    batch, in_size, hidden, out_size = 8, 32, 32, 8

    key = jax.random.PRNGKey(0)
    kx, kp = jax.random.split(key)
    x = jax.random.normal(kx, (batch, in_size), jnp.float32)
    w1, b1, w2, b2 = init_params(kp, in_size, hidden, out_size)

    # Case 1: single-tile path.
    y = jax.block_until_ready(nn_forward(x, w1, b1, w2, b2))
    y_ref = nn_reference(x, w1, b1, w2, b2)
    assert y.shape == (batch, out_size)
    assert jnp.allclose(y, y_ref, atol=1e-5, rtol=1e-5), "mismatch vs reference (B=8)"

    # Case 2: multi-tile grid with padded batch (B=20, TB=8 -> grid=(3,)).
    x2 = jax.random.normal(jax.random.PRNGKey(1), (20, in_size), jnp.float32)
    y2 = jax.block_until_ready(nn_forward(x2, w1, b1, w2, b2, block_b=8))
    y2_ref = nn_reference(x2, w1, b1, w2, b2)
    assert y2.shape == (20, out_size)
    assert jnp.allclose(y2, y2_ref, atol=1e-5, rtol=1e-5), "mismatch vs reference (B=20)"

    # TODO(synk): on v6e/v7x, pass compute_dtype=jnp.bfloat16 for the MXU fast
    # path (accumulation and leaky_relu stay f32); tolerance then relaxes.
    print("KERNEL_OK")
</pallas_src>

<mosaic_0001>
module attributes {stable_mosaic.version = 11 : i64} {
  func.func @_mlp_kernel(%arg0: i32, %arg1: memref<8x128xf32, #tpu.memory_space<vmem>>, %arg2: memref<136x128xf32, #tpu.memory_space<vmem>>, %arg3: memref<136x128xf32, #tpu.memory_space<vmem>>, %arg4: memref<8x128xf32, #tpu.memory_space<vmem>>) attributes {dimension_semantics = [#tpu.dimension_semantics<parallel>], iteration_bounds = array<i64: 1>, scalar_prefetch = 0 : i64, scratch_operands = 0 : i64, tpu.core_type = #tpu.core_type<tc>, window_params = [{transform_indices = @transform_0, window_bounds = array<i64: 8, 128>}, {pipeline_mode = #tpu.pipeline_mode<synchronous>, transform_indices = @transform_1, window_bounds = array<i64: 136, 128>}, {pipeline_mode = #tpu.pipeline_mode<synchronous>, transform_indices = @transform_2, window_bounds = array<i64: 136, 128>}, {transform_indices = @transform_3, window_bounds = array<i64: 8, 128>}]} {
    %c0 = arith.constant 0 : index
    %c0_0 = arith.constant 0 : index
    %0 = vector.load %arg2[%c0, %c0_0] : memref<136x128xf32, #tpu.memory_space<vmem>>, vector<128x128xf32>
    %c128 = arith.constant 128 : index
    %c0_1 = arith.constant 0 : index
    %1 = vector.load %arg2[%c128, %c0_1] : memref<136x128xf32, #tpu.memory_space<vmem>>, vector<1x128xf32>
    %c0_2 = arith.constant 0 : index
    %c0_3 = arith.constant 0 : index
    %2 = vector.load %arg3[%c0_2, %c0_3] : memref<136x128xf32, #tpu.memory_space<vmem>>, vector<128x128xf32>
    %c128_4 = arith.constant 128 : index
    %c0_5 = arith.constant 0 : index
    %3 = vector.load %arg3[%c128_4, %c0_5] : memref<136x128xf32, #tpu.memory_space<vmem>>, vector<1x128xf32>
    %c0_6 = arith.constant 0 : index
    %c0_7 = arith.constant 0 : index
    %4 = vector.load %arg1[%c0_6, %c0_7] : memref<8x128xf32, #tpu.memory_space<vmem>>, vector<8x128xf32>
    %cst = arith.constant dense<0.000000e+00> : vector<8x128xf32>
    %5 = tpu.matmul %4, %0, %cst {dimension_numbers = #tpu.dot_dimension_numbers<[1], [0], [0], [1], [0, 0, 1, 1], [], []>} : vector<8x128xf32>, vector<128x128xf32>, vector<8x128xf32> -> vector<8x128xf32>
    %6 = vector.broadcast %1 : vector<1x128xf32> to vector<8x128xf32>
    %7 = arith.addf %5, %6 : vector<8x128xf32>
    %cst_8 = arith.constant 0.000000e+00 : f32
    %8 = vector.broadcast %cst_8 : f32 to vector<8x128xf32>
    %9 = arith.cmpf ogt, %7, %8 : vector<8x128xf32>
    %cst_9 = arith.constant 0.00999999977 : f32
    %10 = vector.broadcast %cst_9 : f32 to vector<8x128xf32>
    %11 = arith.mulf %10, %7 : vector<8x128xf32>
    %12 = arith.select %9, %7, %11 : vector<8x128xi1>, vector<8x128xf32>
    %cst_10 = arith.constant dense<0.000000e+00> : vector<8x128xf32>
    %13 = tpu.matmul %12, %2, %cst_10 {dimension_numbers = #tpu.dot_dimension_numbers<[1], [0], [0], [1], [0, 0, 1, 1], [], []>} : vector<8x128xf32>, vector<128x128xf32>, vector<8x128xf32> -> vector<8x128xf32>
    %14 = vector.broadcast %3 : vector<1x128xf32> to vector<8x128xf32>
    %15 = arith.addf %13, %14 : vector<8x128xf32>
    %c0_11 = arith.constant 0 : index
    %c0_12 = arith.constant 0 : index
    %16 = vector.load %arg4[%c0_11, %c0_12] : memref<8x128xf32, #tpu.memory_space<vmem>>, vector<8x128xf32>
    tpu.vector_store %arg4[%c0_11, %c0_12], %15 {strides = array<i32>} : memref<8x128xf32, #tpu.memory_space<vmem>>, vector<8x128xf32>,
    return
  }
  func.func @transform_0(%arg0: i32) -> (i32, i32) {
    %c0_i32 = arith.constant 0 : i32
    %c0_i32_0 = arith.constant 0 : i32
    return %arg0, %c0_i32 : i32, i32
  }
  func.func @transform_1(%arg0: i32) -> (i32, i32) {
    %c0_i32 = arith.constant 0 : i32
    %c0_i32_0 = arith.constant 0 : i32
    %c0_i32_1 = arith.constant 0 : i32
    return %c0_i32, %c0_i32_0 : i32, i32
  }
  func.func @transform_2(%arg0: i32) -> (i32, i32) {
    %c0_i32 = arith.constant 0 : i32
    %c0_i32_0 = arith.constant 0 : i32
    %c0_i32_1 = arith.constant 0 : i32
    return %c0_i32, %c0_i32_0 : i32, i32
  }
  func.func @transform_3(%arg0: i32) -> (i32, i32) {
    %c0_i32 = arith.constant 0 : i32
    %c0_i32_0 = arith.constant 0 : i32
    return %arg0, %c0_i32 : i32, i32
  }
}

</mosaic_0001>

<bundles_post_ra>
// kernel: tpu_custom_call.1
= control target key start
LH: loop header
LB: loop body
LE: loop exit
PB: predicated region body
PF: predicated region fallthrough
CT: control target
= control target key end

     0   :  { %8 = vsyncpa [#allocation3], 0  ;;  %s531_s0 = inlined_call_operand.hbm [shape: f32[8,128], index: 0, kind: input, shape index: {}]   ;;  %s532_s1 = inlined_call_operand.hbm [shape: f32[136,128], index: 1, kind: input, shape index: {}]   ;;  %s533_s2 = inlined_call_operand.hbm [shape: f32[136,128], index: 2, kind: input, shape index: {}]   ;;  %s534_s3 = inlined_call_operand.hbm [shape: f32[8,128], index: 3, kind: output, shape index: {}]  }
   0x1   :  { %9 = vsyncpa [#allocation6], 0 }
   0x2   :  { %10 = vsyncpa [#allocation4], 0  ;;  %s457_s12 = smov [#allocation5]  }
   0x3   :  { %s26_s13 = sshll.u32 %s457_s12, 4  ;;  %s27_s13 = int_to_ptr.vmem [resolvable:$true] %s26_s13 }
   0x4   :  { %s379_s14 = scalar_lea.vmem %s27_s13, 2176  ;;  %p384_p1 = scmp.lt.s32.totalorder %s27_s13, %s27_s13 }
   0x5   :  { %p380_p0 = scmp.ne.s32.totalorder %s27_s13, %s379_s14  ;;  %p385_p2 = scmp.lt.s32.totalorder %s379_s14, %s379_s14 }
   0x7   :  { %p386_p3 = por %p385_p2, %p384_p1 }
   0x9   :  { %p387_p4 = pnand %p386_p3, %p380_p0 }
   0xb   :  { %390 = shalt.err (!%p387_p4)
}
   0xc   :  { %s458_s15 = smov 128   ;;  %s459_s16 = smov 8  }
   0xd   :  { %32 = dma.hbm_to_vmem [thread:$0]  %s532_s1, 2176, %s27_s13, [#allocation6], %s458_s15, %s458_s15, %s459_s16  }
   0xe   :  { %s460_s19 = smov [#allocation2]   ;;  %s461_s21 = smov [#allocation7]  }
   0xf   :  { %s17_s20 = sshll.u32 %s460_s19, 4  ;;  %s38_s22 = sshll.u32 %s461_s21, 4  ;;  %s18_s20 = int_to_ptr.vmem [resolvable:$true] %s17_s20  ;;  %s39_s22 = int_to_ptr.vmem [resolvable:$true] %s38_s22 }
  0x10   :  { %s399_s23 = scalar_lea.vmem %s18_s20, 128  ;;  %p404_p6 = scmp.lt.s32.totalorder %s18_s20, %s18_s20 }
  0x11   :  { %p400_p5 = scmp.ne.s32.totalorder %s18_s20, %s399_s23  ;;  %p405_p7 = scmp.lt.s32.totalorder %s399_s23, %s399_s23 }
  0x13   :  { %p406_p8 = por %p405_p7, %p404_p6 }
  0x15   :  { %p407_p9 = pnand %p406_p8, %p400_p5 }
  0x17   :  { %410 = shalt.err (!%p407_p9)
}
  0x18   :  { %20 = dma.hbm_to_vmem [thread:$0]  %s531_s0, 128, %s18_s20, [#allocation3]  }
  0x19   :  { %s419_s26 = scalar_lea.vmem %s39_s22, 2176  ;;  %p424_p11 = scmp.lt.s32.totalorder %s39_s22, %s39_s22 }
  0x1a   :  { %p420_p10 = scmp.ne.s32.totalorder %s39_s22, %s419_s26  ;;  %p425_p12 = scmp.lt.s32.totalorder %s419_s26, %s419_s26 }
  0x1c   :  { %p426_p13 = por %p425_p12, %p424_p11 }
  0x1e   :  { %p427_p0 = pnand %p426_p13, %p420_p10 }
  0x20   :  { %430 = shalt.err (!%p427_p0)
}
  0x21   :  { %44 = dma.hbm_to_vmem [thread:$0]  %s533_s2, 2176, %s39_s22, [#allocation6], %s458_s15, %s458_s15, %s459_s16  }
  0x22   :  { %451 = dma.done.wait [#allocation3], 128  }
  0x23   :  { %452 = vsyncadd [#allocation3], 4294967168 }
  0x24   :  { %453 = dma.done.wait [#allocation6], 4352  }
  0x25   :  { %454 = vsyncadd [#allocation6], 4294962944  ;;  %v462_v0 = vmov 0.0   ;;  %vm463_vm0 = vmmov 0   ;;  %v69_v1 = vld [vmem:[#allocation5 + $0x78] sm:$0xff]  ;;  %v68_v2 = vld [vmem:[#allocation5 + $0x70] sm:$0xff] }
  0x26   :  { %293 = vmatprep.subr.mxu0 %v462_v0  ;;  %325 = vmatprep.mubr.msk.f32.mxu0 %vm463_vm0, %v462_v0  ;;  %v67_v3 = vld [vmem:[#allocation5 + $0x68] sm:$0xff]  ;;  %v66_v4 = vld [vmem:[#allocation5 + $0x60] sm:$0xff]  ;;  %v65_v6 = vld [vmem:[#allocation5 + $0x58] sm:$0xff]  ;;  %s464_s0 = smov [#allocation8]  }
  0x27   :  { %328 = vmatprep.subr.mxu1 %v462_v0  ;;  %360 = vmatprep.mubr.msk.f32.mxu1 %vm463_vm0, %v462_v0  ;;  %v86_v5 = vld [vmem:[#allocation7 + $0x78] sm:$0xff]  ;;  %v85_v7 = vld [vmem:[#allocation7 + $0x70] sm:$0xff]  ;;  %v84_v8 = vld [vmem:[#allocation7 + $0x68] sm:$0xff]  ;;  %s247_s2 = sshll.u32 %s464_s0, 4  ;;  %s248_s2 = int_to_ptr.vmem [resolvable:$true] %s247_s2 }
  0x28   :  { %294 = vmatpush3.msra.mxu0 %v69_v1  ;;  %329 = vmatpush3.msra.mxu1 %v86_v5  ;;  %v64_v9 = vld [vmem:[#allocation5 + $0x50] sm:$0xff]  ;;  %v83_v10 = vld [vmem:[#allocation7 + $0x60] sm:$0xff]  ;;  %v82_v12 = vld [vmem:[#allocation7 + $0x58] sm:$0xff]  ;;  %s431_s28 = scalar_lea.vmem %s248_s2, 128  ;;  %p436_p2 = scmp.lt.s32.totalorder %s248_s2, %s248_s2 }
  0x29   :  { %295 = vmatprep.subr.mxu0 %v462_v0  ;;  %330 = vmatprep.subr.mxu1 %v462_v0  ;;  %v63_v11 = vld [vmem:[#allocation5 + $0x48] sm:$0xff]  ;;  %v62_v13 = vld [vmem:[#allocation5 + $0x40] sm:$0xff]  ;;  %v81_v14 = vld [vmem:[#allocation7 + $0x50] sm:$0xff]  ;;  %p432_p1 = scmp.ne.s32.totalorder %s248_s2, %s431_s28  ;;  %p437_p3 = scmp.lt.s32.totalorder %s431_s28, %s431_s28 }
  0x2a   :  { %296 = vmatpush3.msra.mxu0 %v68_v2  ;;  %331 = vmatpush3.msra.mxu1 %v85_v7  ;;  %v61_v15 = vld [vmem:[#allocation5 + $0x38] sm:$0xff]  ;;  %v80_v16 = vld [vmem:[#allocation7 + $0x48] sm:$0xff]  ;;  %v79_v18 = vld [vmem:[#allocation7 + $0x40] sm:$0xff] }
  0x2b   :  { %297 = vmatprep.subr.mxu0 %v462_v0  ;;  %332 = vmatprep.subr.mxu1 %v462_v0  ;;  %v60_v17 = vld [vmem:[#allocation5 + $0x30] sm:$0xff]  ;;  %v59_v19 = vld [vmem:[#allocation5 + $0x28] sm:$0xff]  ;;  %v78_v20 = vld [vmem:[#allocation7 + $0x38] sm:$0xff]  ;;  %p438_p4 = por %p437_p3, %p436_p2 }
  0x2c   :  { %298 = vmatpush3.msra.mxu0 %v67_v3  ;;  %333 = vmatpush3.msra.mxu1 %v84_v8  ;;  %v58_v21 = vld [vmem:[#allocation5 + $0x20] sm:$0xff]  ;;  %v77_v22 = vld [vmem:[#allocation7 + $0x30] sm:$0xff]  ;;  %v76_v24 = vld [vmem:[#allocation7 + $0x28] sm:$0xff] }
  0x2d   :  { %299 = vmatprep.subr.mxu0 %v462_v0  ;;  %334 = vmatprep.subr.mxu1 %v462_v0  ;;  %v57_v23 = vld [vmem:[#allocation5 + $0x18] sm:$0xff]  ;;  %v56_v25 = vld [vmem:[#allocation5 + $0x10] sm:$0xff]  ;;  %v75_v26 = vld [vmem:[#allocation7 + $0x20] sm:$0xff]  ;;  %p439_p5 = pnand %p438_p4, %p432_p1 }
  0x2e   :  { %300 = vmatpush3.msra.mxu0 %v66_v4  ;;  %335 = vmatpush3.msra.mxu1 %v83_v10  ;;  %v55_v27 = vld [vmem:[#allocation5 + $0x8] sm:$0xff]  ;;  %v74_v28 = vld [vmem:[#allocation7 + $0x18] sm:$0xff]  ;;  %v88_v30 = vld [vmem:[#allocation2] sm:$0xff] }
  0x2f   :  { %301 = vmatprep.subr.mxu0 %v462_v0  ;;  %336 = vmatprep.subr.mxu1 %v462_v0  ;;  %v54_v29 = vld [vmem:[#allocation5] sm:$0xff]  ;;  %v73_v31 = vld [vmem:[#allocation7 + $0x10] sm:$0xff]  ;;  %v72_v32 = vld [vmem:[#allocation7 + $0x8] sm:$0xff] }
  0x30   :  { %302 = vmatpush3.msra.mxu0 %v65_v6  ;;  %337 = vmatpush3.msra.mxu1 %v82_v12  ;;  %v71_v33 = vld [vmem:[#allocation7] sm:$0xff]  ;;  %v257_v34 = vld [vmem:[#allocation5 + $0x80] ss:$0 sm:$0xff] }
  0x31   :  { %303 = vmatprep.subr.mxu0 %v462_v0  ;;  %338 = vmatprep.subr.mxu1 %v462_v0  ;;  %v258_v40 = vld [vmem:[#allocation7 + $0x80] ss:$0 sm:$0xff] }
  0x32   :  { %304 = vmatpush3.msra.mxu0 %v64_v9  ;;  %339 = vmatpush3.msra.mxu1 %v81_v14 }
  0x33   :  { %305 = vmatprep.subr.mxu0 %v462_v0  ;;  %340 = vmatprep.subr.mxu1 %v462_v0 }
  0x34   :  { %306 = vmatpush3.msra.mxu0 %v63_v11  ;;  %341 = vmatpush3.msra.mxu1 %v80_v16 }
  0x35   :  { %307 = vmatprep.subr.mxu0 %v462_v0  ;;  %342 = vmatprep.subr.mxu1 %v462_v0 }
  0x36   :  { %308 = vmatpush3.msra.mxu0 %v62_v13  ;;  %343 = vmatpush3.msra.mxu1 %v79_v18 }
  0x37   :  { %309 = vmatprep.subr.mxu0 %v462_v0  ;;  %344 = vmatprep.subr.mxu1 %v462_v0 }
  0x38   :  { %310 = vmatpush3.msra.mxu0 %v61_v15  ;;  %345 = vmatpush3.msra.mxu1 %v78_v20 }
  0x39   :  { %311 = vmatprep.subr.mxu0 %v462_v0  ;;  %346 = vmatprep.subr.mxu1 %v462_v0 }
  0x3a   :  { %312 = vmatpush3.msra.mxu0 %v60_v17  ;;  %347 = vmatpush3.msra.mxu1 %v77_v22 }
  0x3b   :  { %313 = vmatprep.subr.mxu0 %v462_v0  ;;  %348 = vmatprep.subr.mxu1 %v462_v0 }
  0x3c   :  { %314 = vmatpush3.msra.mxu0 %v59_v19  ;;  %349 = vmatpush3.msra.mxu1 %v76_v24 }
  0x3d   :  { %315 = vmatprep.subr.mxu0 %v462_v0  ;;  %350 = vmatprep.subr.mxu1 %v462_v0 }
  0x3e   :  { %316 = vmatpush3.msra.mxu0 %v58_v21  ;;  %351 = vmatpush3.msra.mxu1 %v75_v26 }
  0x3f   :  { %317 = vmatprep.subr.mxu0 %v462_v0  ;;  %352 = vmatprep.subr.mxu1 %v462_v0 }
  0x40   :  { %318 = vmatpush3.msra.mxu0 %v57_v23  ;;  %353 = vmatpush3.msra.mxu1 %v74_v28 }
  0x41   :  { %319 = vmatprep.subr.mxu0 %v462_v0  ;;  %354 = vmatprep.subr.mxu1 %v462_v0 }
  0x42   :  { %320 = vmatpush3.msra.mxu0 %v56_v25  ;;  %355 = vmatpush3.msra.mxu1 %v73_v31 }
  0x43   :  { %321 = vmatprep.subr.mxu0 %v462_v0  ;;  %356 = vmatprep.subr.mxu1 %v462_v0 }
  0x44   :  { %322 = vmatpush3.msra.mxu0 %v55_v27  ;;  %357 = vmatpush3.msra.mxu1 %v72_v32 }
  0x45   :  { %323 = vmatprep.subr.mxu0 %v462_v0  ;;  %358 = vmatprep.subr.mxu1 %v462_v0 }
  0x46   :  { %324 = vmatpush3.msra.mxu0 %v54_v29  ;;  %359 = vmatpush3.msra.mxu1 %v71_v33 }
  0x47   :  { %326 = vmatmul.mubr.f32.vlgmr.msra.gmra.mxu0 %v88_v30 }
 0x107   :  { %v159_v35 = vpop.f32.mrf.mxu0 }
 0x108   :  { %v160_v36 = vadd.f32 %v257_v34, %v159_v35 }
 0x109   :  { %v327_v37 = vpop.f32.mrf.mxu0 }
 0x10a   :  { %v164_v38 = vmul.f32 0.01, %v160_v36  ;;  %vm163_vm1 = vcmp.gt.f32.partialorder %v160_v36, 0.0 }
 0x10c   :  { %v165_v39 = vsel %vm163_vm1, %v160_v36, %v164_v38 }
 0x10d   :  { %361 = vmatmul.mubr.f32.vlgmr.msra.gmra.mxu1 %v165_v39 }
 0x1cd   :  { %v236_v41 = vpop.f32.mrf.mxu1 }
 0x1ce   :  { %v237_v42 = vadd.f32 %v258_v40, %v236_v41 }
 0x1cf   :  { %v362_v43 = vpop.f32.mrf.mxu1 }
 0x1d0   :  { %240 = vst [vmem:[#allocation8] sm:$0xff] %v237_v42 }
 0x1d1   :  { %442 = shalt.err (!%p439_p5)
}
 0x1d2   :  { %250 = dma.vmem_to_hbm [thread:$0]  %s248_s2, 128, %s534_s3, [#allocation4]  }
 0x1d3   :  { %455 = dma.done.wait [#allocation4], 128  }
 0x1d4   :  { %456 = vsyncadd [#allocation4], 4294967168 }
 0x1d5   :  { %254 = vsyncpa [#allocation3], 1 }
 0x1d6   :  { %255 = vsyncpa [#allocation6], 1 }
 0x1d7   :  { %256 = vsyncpa [#allocation4], 1 }

</bundles_post_ra>
